<compile_context>
chip_gen: v7x
topology: tpu7x:2x2x1
jax: 0.10.0
libtpu: 0.0.40
codegen_flags: <defaults>
</compile_context>

<pallas_src>
import functools

import jax
import jax.numpy as jnp
from jax.experimental import pallas as pl
from jax.experimental.pallas import tpu as pltpu


def _ls_ce_kernel(t_ref, x_ref, out_ref, *, smoothing, n_valid, tile_m):
    i = pl.program_id(0)

    x = x_ref[...]                                # (tile_m, C), native dtype
    t = t_ref[...]                                # (tile_m, 1) int32
    c = x.shape[1]

    # Numerically stable per-row logsumexp; cast per-use (no full-tile f32 copy held live).
    m = jnp.max(x.astype(jnp.float32), axis=1, keepdims=True)                        # (tm, 1)
    sumexp = jnp.sum(jnp.exp(x.astype(jnp.float32) - m), axis=1, keepdims=True)      # (tm, 1)
    z = m + jnp.log(sumexp)                                                          # logsumexp

    # Fused weighted class reduction:  on = 1-s at target, off = s/(C-1) elsewhere (weights sum to 1).
    on = jnp.float32(1.0 - smoothing)
    off = jnp.float32(smoothing / (c - 1))
    class_ids = jax.lax.broadcasted_iota(jnp.int32, x.shape, 1)                      # (tm, C)
    w = jnp.where(class_ids == t, on, off)                                           # (tm, C)
    s = jnp.sum(x.astype(jnp.float32) * w, axis=1, keepdims=True)                    # (tm, 1)
    loss_rows = z - s                                                                # (tm, 1)

    # Ragged N: the last block may contain out-of-bounds garbage rows; mask BEFORE the tile sum.
    row_ids = i * tile_m + jax.lax.broadcasted_iota(jnp.int32, (tile_m, 1), 0)
    loss_rows = jnp.where(row_ids < n_valid, loss_rows, 0.0)

    # Independent lane-dense partial-sum block per grid step.
    out_ref[...] = jnp.full((1, 1, 128), jnp.sum(loss_rows), dtype=jnp.float32)


def _vmem_capacity_bytes():
    try:
        return int(pltpu.get_tpu_info().vmem_capacity_bytes)
    except Exception:
        return 64 << 20   # conservative default (v7x per-TC VMEM)


def _auto_tile_m(n, c, itemsize, sublane, budget):
    """Largest row tile with a ~budget-sized logits block; prefer >= 2 tiles for pipelining/megacore."""
    tm = max(sublane, ((budget // max(c * itemsize, 1)) // sublane) * sublane)
    n_pad = int(pl.cdiv(n, sublane)) * sublane
    tm = min(tm, n_pad)
    if tm >= n_pad and n_pad >= 2 * sublane:
        tm = int(pl.cdiv(int(pl.cdiv(n_pad, 2)), sublane)) * sublane
    return int(tm)


def label_smoothing_cross_entropy(inputs, targets, smoothing=0.1, tile_m=None):
    """inputs: (N, C) float logits; targets: (N,) int class ids -> scalar mean loss."""
    n, c = inputs.shape
    itemsize = jnp.dtype(inputs.dtype).itemsize
    sublane = 32 if itemsize == 1 else (16 if itemsize == 2 else 8)

    # Generation-aware block budget / VMEM limit.
    vmem_cap = _vmem_capacity_bytes()
    if vmem_cap >= (100 << 20):          # v5e / v6e: 128 MiB physical VMEM
        budget, vmem_limit = 12 << 20, 96 << 20
    else:                                # v7x: 64 MiB per-TC
        budget, vmem_limit = 6 << 20, 44 << 20

    if tile_m is None:
        tile_m = _auto_tile_m(n, c, itemsize, sublane, budget)
    tile_m = int(pl.cdiv(int(tile_m), sublane)) * sublane   # respect dtype sublane packing

    num_tiles = int(pl.cdiv(n, tile_m))

    # Targets are tiny; reshape only (no logits pad -> no extra HBM round-trip for ragged N).
    t = targets.astype(jnp.int32).reshape(n, 1)

    kernel = functools.partial(
        _ls_ce_kernel, smoothing=float(smoothing), n_valid=n, tile_m=tile_m
    )

    cost = pl.CostEstimate(
        flops=5 * n * c,
        transcendentals=n * c,
        bytes_accessed=n * c * itemsize + n * 4 + num_tiles * 128 * 4,
    )

    partials = pl.pallas_call(
        kernel,
        out_shape=jax.ShapeDtypeStruct((num_tiles, 1, 128), jnp.float32),
        grid_spec=pltpu.PrefetchScalarGridSpec(
            num_scalar_prefetch=0,
            grid=(num_tiles,),
            in_specs=[
                pl.BlockSpec((tile_m, 1), lambda i: (i, 0)),    # targets tile
                pl.BlockSpec((tile_m, c), lambda i: (i, 0)),    # logits tile (full-width C)
            ],
            out_specs=pl.BlockSpec((1, 1, 128), lambda i: (i, 0, 0)),
        ),
        compiler_params=pltpu.CompilerParams(
            dimension_semantics=("parallel",),   # independent per-tile partials -> megacore OK
            vmem_limit_bytes=vmem_limit,
        ),
        cost_estimate=cost,
    )(t, inputs)

    # All 128 lanes of each partial block hold the same tile sum; read lane 0.
    return partials[:, 0, 0].sum() / jnp.float32(n)


def _reference(inputs, targets, smoothing=0.1):
    # Mirrors the PyTorch module exactly: off = s/(C-1), on = 1-s.
    n, c = inputs.shape
    off = smoothing / (c - 1)
    onehot = jax.nn.one_hot(targets, c, dtype=jnp.float32)
    smooth = onehot * (1.0 - smoothing) + (1.0 - onehot) * off
    log_probs = jax.nn.log_softmax(inputs.astype(jnp.float32), axis=1)
    return -(smooth * log_probs).sum(axis=1).mean()


if __name__ == "__main__":
    key = jax.random.PRNGKey(0)

    # Case 1: small ragged shapes (N not a multiple of the tile, C not lane-aligned),
    # explicit tile_m -> multi-tile grid with a masked out-of-bounds last block.
    k1, k2, k3, k4 = jax.random.split(key, 4)
    N1, C1 = 77, 10
    logits1 = jax.random.normal(k1, (N1, C1), dtype=jnp.float32)
    targets1 = jax.random.randint(k2, (N1,), 0, C1, dtype=jnp.int32)
    ref1 = _reference(logits1, targets1, smoothing=0.1)
    loss1 = label_smoothing_cross_entropy(logits1, targets1, smoothing=0.1, tile_m=32)
    loss1 = jax.block_until_ready(loss1)
    assert jnp.allclose(loss1, ref1, atol=1e-4, rtol=1e-5), (loss1, ref1)

    # Case 2: aligned shapes, auto tile size (exercises the >=2-tile split + VMEM budgeting).
    N2, C2 = 128, 32
    logits2 = jax.random.normal(k3, (N2, C2), dtype=jnp.float32)
    targets2 = jax.random.randint(k4, (N2,), 0, C2, dtype=jnp.int32)
    ref2 = _reference(logits2, targets2, smoothing=0.1)
    loss2 = label_smoothing_cross_entropy(logits2, targets2, smoothing=0.1)
    loss2 = jax.block_until_ready(loss2)
    assert jnp.allclose(loss2, ref2, atol=1e-4, rtol=1e-5), (loss2, ref2)

    print("KERNEL_OK")
</pallas_src>

<mosaic_0001>
module attributes {stable_mosaic.version = 11 : i64} {
  func.func @_ls_ce_kernel(%arg0: i32, %arg1: memref<32x1xi32, #tpu.memory_space<vmem>>, %arg2: memref<32x10xf32, #tpu.memory_space<vmem>>, %arg3: memref<1x1x128xf32, #tpu.memory_space<vmem>>) attributes {dimension_semantics = [#tpu.dimension_semantics<parallel>], iteration_bounds = array<i64: 3>, scalar_prefetch = 0 : i64, scratch_operands = 0 : i64, tpu.core_type = #tpu.core_type<tc>, window_params = [{transform_indices = @transform_0, window_bounds = array<i64: 32, 1>}, {transform_indices = @transform_1, window_bounds = array<i64: 32, 10>}, {transform_indices = @transform_2, window_bounds = array<i64: 1, 1, 128>}]} {
    %c0 = arith.constant 0 : index
    %c0_0 = arith.constant 0 : index
    %0 = vector.load %arg2[%c0, %c0_0] : memref<32x10xf32, #tpu.memory_space<vmem>>, vector<32x10xf32>
    %c0_1 = arith.constant 0 : index
    %c0_2 = arith.constant 0 : index
    %1 = vector.load %arg1[%c0_1, %c0_2] : memref<32x1xi32, #tpu.memory_space<vmem>>, vector<32x1xi32>
    %cst = arith.constant dense<0xFF800000> : vector<32xf32>
    %2 = vector.multi_reduction <maximumf>, %0, %cst [1] : vector<32x10xf32> to vector<32xf32>
    %3 = vector.shape_cast %2 : vector<32xf32> to vector<32x1xf32>
    %4 = vector.broadcast %3 : vector<32x1xf32> to vector<32x10xf32>
    %5 = arith.subf %0, %4 : vector<32x10xf32>
    %6 = math.exp %5 : vector<32x10xf32>
    %cst_3 = arith.constant dense<0.000000e+00> : vector<32xf32>
    %7 = vector.multi_reduction <add>, %6, %cst_3 [1] : vector<32x10xf32> to vector<32xf32>
    %8 = vector.shape_cast %7 : vector<32xf32> to vector<32x1xf32>
    %9 = math.log %8 : vector<32x1xf32>
    %10 = arith.addf %3, %9 : vector<32x1xf32>
    %11 = tpu.iota {dimensions = array<i32: 1>} : vector<32x10xi32>
    %12 = vector.broadcast %1 : vector<32x1xi32> to vector<32x10xi32>
    %13 = arith.cmpi eq, %11, %12 : vector<32x10xi32>
    %cst_4 = arith.constant 0.899999976 : f32
    %cst_5 = arith.constant 0.0111111114 : f32
    %14 = vector.broadcast %cst_4 : f32 to vector<32x10xf32>
    %15 = vector.broadcast %cst_5 : f32 to vector<32x10xf32>
    %16 = arith.select %13, %14, %15 : vector<32x10xi1>, vector<32x10xf32>
    %17 = arith.mulf %0, %16 : vector<32x10xf32>
    %cst_6 = arith.constant dense<0.000000e+00> : vector<32xf32>
    %18 = vector.multi_reduction <add>, %17, %cst_6 [1] : vector<32x10xf32> to vector<32xf32>
    %19 = vector.shape_cast %18 : vector<32xf32> to vector<32x1xf32>
    %20 = arith.subf %10, %19 : vector<32x1xf32>
    %c32_i32 = arith.constant 32 : i32
    %21 = arith.muli %arg0, %c32_i32 : i32
    %22 = tpu.iota {dimensions = array<i32: 0>} : vector<32x1xi32>
    %23 = vector.broadcast %21 : i32 to vector<32x1xi32>
    %24 = arith.addi %23, %22 : vector<32x1xi32>
    %c77_i32 = arith.constant 77 : i32
    %25 = vector.broadcast %c77_i32 : i32 to vector<32x1xi32>
    %26 = arith.cmpi slt, %24, %25 : vector<32x1xi32>
    %cst_7 = arith.constant 0.000000e+00 : f32
    %27 = vector.broadcast %cst_7 : f32 to vector<32x1xf32>
    %28 = arith.select %26, %20, %27 : vector<32x1xi1>, vector<32x1xf32>
    %29 = vector.shape_cast %28 : vector<32x1xf32> to vector<1x32x1xf32>
    %cst_8 = arith.constant dense<0.000000e+00> : vector<1xf32>
    %30 = vector.multi_reduction <add>, %29, %cst_8 [1, 2] : vector<1x32x1xf32> to vector<1xf32>
    %31 = vector.shape_cast %30 : vector<1xf32> to vector<1x1x1xf32>
    %32 = vector.extract %31[0, 0, 0] : f32 from vector<1x1x1xf32>
    %33 = vector.broadcast %32 : f32 to vector<1x1x128xf32>
    %c0_9 = arith.constant 0 : index
    %c0_10 = arith.constant 0 : index
    %c0_11 = arith.constant 0 : index
    %34 = vector.load %arg3[%c0_9, %c0_10, %c0_11] : memref<1x1x128xf32, #tpu.memory_space<vmem>>, vector<1x1x128xf32>
    tpu.vector_store %arg3[%c0_9, %c0_10, %c0_11], %33 {strides = array<i32>} : memref<1x1x128xf32, #tpu.memory_space<vmem>>, vector<1x1x128xf32>,
    return
  }
  func.func @transform_0(%arg0: i32) -> (i32, i32) {
    %c0_i32 = arith.constant 0 : i32
    %c0_i32_0 = arith.constant 0 : i32
    return %arg0, %c0_i32 : i32, i32
  }
  func.func @transform_1(%arg0: i32) -> (i32, i32) {
    %c0_i32 = arith.constant 0 : i32
    %c0_i32_0 = arith.constant 0 : i32
    return %arg0, %c0_i32 : i32, i32
  }
  func.func @transform_2(%arg0: i32) -> (i32, i32, i32) {
    %c0_i32 = arith.constant 0 : i32
    %c0_i32_0 = arith.constant 0 : i32
    %c0_i32_1 = arith.constant 0 : i32
    return %arg0, %c0_i32, %c0_i32_0 : i32, i32, i32
  }
}

</mosaic_0001>

<bundles_post_ra>
// kernel: tpu_custom_call.1
= control target key start
LH: loop header
LB: loop body
LE: loop exit
PB: predicated region body
PF: predicated region fallthrough
CT: control target
= control target key end

     0   :  { %7 = vsyncpa [#allocation3], 0  ;;  %s718_s0 = inlined_call_operand.vmem [shape: s32[77,1], index: 0, kind: input, shape index: {}]   ;;  %s719_s1 = inlined_call_operand.vmem [shape: f32[77,10], index: 1, kind: input, shape index: {}]   ;;  %s720_s2 = inlined_call_operand.hbm [shape: f32[3,1,128], index: 2, kind: output, shape index: {}]  }
   0x1   :  { %9 = vsyncpa [#allocation3 + $0x1], 0  ;;  %s577_s9 = smov 0   ;;  %s579_s10 = smov 0  }
   0x2   :  { %s581_s11 = smov 0   ;;  %s583_s12 = smov 0  }
   0x3 LB: > { %s598_s13 = sadd.s32 4294967295, %s557_s12   ;;  %s422_s14 = sadd.s32 4294967294, %s557_s12   ;;  %s557_s12 = sphi %s583_s12, %s726_s12   ;;  %s553_s11 = sphi %s581_s11, %s725_s11   ;;  %s549_s10 = sphi %s579_s10, %s724_s10   ;;  %s545_s9 = sphi %s577_s9, %s723_s9  }
   0x4   : > { %s602_s15 = sadd.s32 1, %s557_s12   ;;  %s74_s16 = sadd.s32 1, %s553_s11 }
   0x5   : > { %s71_s17 = ssub.s32 %s557_s12, %s602_s15  ;;  %p84_p0 = scmp.ne.s32.totalorder %s553_s11, %s549_s10 }
   0x6   : > { %p72_p1 = scmp.eq.s32.totalorder %s71_s17, 0  ;;  %p85_p2 = scmp.eq.s32.totalorder %s598_s13, 2 }
   0x7   : > { %p90_p3 = scmp.ne.s32.totalorder %s549_s10, %s545_s9  ;;  %p91_p4 = scmp.eq.s32.totalorder %s422_s14, 2 }
   0x8   : > { %s613_s18 = scalar_select %p72_p1, %s553_s11, %s74_s16  }
   0x9   : > { %p615_p5 = por %p85_p2, %p84_p0  ;;  %p619_p6 = por %p91_p4, %p90_p3 }
   0xa   : > { %p425_p7 = scmp.ge.s32.totalorder %s557_s12, 1  ;;  %p143_p8 = scmp.lt.s32.totalorder %s557_s12, 4 }
   0xc   : > { %p144_p9 = pnand %p425_p7, %p143_p8 }
   0xd   : > { %s426_s21 = sshll.u32 (!%p144_p9), %s598_s13, 2  ;;  %v559_v0 = vmov (!%p144_p9), 0   ;;  %vm213_vm0 = vcmask (!%p144_p9), 80896   ;;  %v262_v25 = vlaneseq (!%p144_p9)  ;;  %v560_v31 = vmov (!%p144_p9), 0.011111111   ;;  %s430_s29 = sshll.u32 (!%p144_p9), %s598_s13, 5 }
   0xe   : > { %147 = sbr.rel (%p144_p9) target bundleno = 575 (0x23f), region = 28  ;;  %p182_p10 = scmp.lt.s32.totalorder (!%p144_p9), %s426_s21, 9  ;;  %478 = vset.pattern.permute.xlu1 (!%p144_p9), %v559_v0  ;;  %477 = vset.pattern.permute.xlu0 (!%p144_p9), %v559_v0  ;;  %v310_v58 = vstv (!%p144_p9), %s430_s29  ;;  %vm323_vm8 = vcmask (!%p144_p9), 7168  }
   0xf   : > { %v263_v27 = vand.u32 (!%p144_p9), 127, %v262_v25  ;;  %v306_v56 = vshrl.u32 (!%p144_p9), %v262_v25, 7  ;;  %s175_s30 = sand.u32 (!%p144_p9), 1, %s549_s10   ;;  %s431_s5 = sshll.u32 (!%p144_p9), %s598_s13, 4 }
  0x10   : > { %s176_s3 = scalar_lea.vmem (!%p144_p9), [#allocation2], %s175_s30  ;;  %s678_s14 = scalar_lea.hbm (!%p144_p9), %s720_s2, %s431_s5 }
  0x11   : > { %v308_v61 = vadd.s32 (!%p144_p9), 16, %v306_v56  ;;  %v307_v62 = vadd.s32 (!%p144_p9), 8, %v306_v56  ;;  %v311_v0 = vadd.s32 (!%p144_p9), %v310_v58, %v306_v56  ;;  %s355_s4 = sshll.u32 (!%p144_p9), %s176_s3, 4  ;;  %s343_s16 = scalar_lea.sflag (!%p144_p9), [#allocation3], %s175_s30  ;;  %s673_s4 = int_to_ptr.vmem [resolvable:$true] %s355_s4 }
  0x12   : > { %s495_s17 = scalar_lea.vmem (!%p144_p9), %s673_s4, 16  ;;  %s561_s13 = smov (!%p144_p9), [#allocation2]  }
  0x13   : > { %vm315_vm5 = vcmp.lt.s32.totalorder (!%p144_p9), %v311_v0, 77  ;;  %p496_p11 = scmp.ne.s32.totalorder (!%p144_p9), %s673_s4, %s495_s17 }
  0x15   : > { %s728_s21 = smov (!%p182_p10, %s426_s21), 9  ;;  %p497_p12 = pnand %p496_p11, %p615_p5 }
  0x16   : > { %s427_s22 = sshll.u32 %s728_s21, 3  ;;  %s499_s21 = sshll.u32 %s561_s13, 4  ;;  %s500_s21 = int_to_ptr.vmem [resolvable:$false] %s499_s21 }
  0x17   : > { %s199_s25 = scalar_lea.vmem %s719_s1, %s427_s22  ;;  %s185_s28 = scalar_lea.vmem %s718_s0, %s427_s22 }
  0x18   : > { %v205_v1 = vld [vmem:[%s199_s25] sm:$0xff]  ;;  %v207_v2 = vld [vmem:[%s199_s25 + $0x10] sm:$0xff]  ;;  %v629_v3 = vld [vmem:[%s199_s25 + $0x8] sm:$0xff]  ;;  %p498_p13 = pneg %p497_p12  ;;  %s501_s22 = scalar_lea.vmem %s500_s21, 32 }
  0x19   : > { %v214_v4 = vsel %vm213_vm0, %v205_v1, -inf  ;;  %v220_v5 = vsel %vm213_vm0, %v207_v2, -inf  ;;  %v633_v6 = vld [vmem:[%s199_s25 + $0x18] sm:$0xff]  ;;  %v217_v7 = vsel %vm213_vm0, %v629_v3, -inf  ;;  %v210_v9 = vld [vmem:[%s185_s28 + $0x8] sm:$0xff]  ;;  %v211_v10 = vld [vmem:[%s185_s28 + $0x10] sm:$0xff]  ;;  %p502_p0 = scmp.lt.s32.totalorder %s673_s4, %s500_s21  ;;  %p503_p1 = scmp.lt.s32.totalorder %s501_s22, %s495_s17 }
  0x1a   : > { %215 = vmax.xlane.f32.xlu0 %v214_v4  ;;  %221 = vmax.xlane.f32.xlu1 %v220_v5  ;;  %v223_v8 = vsel %vm213_vm0, %v633_v6, -inf  ;;  %v209_v11 = vld [vmem:[%s185_s28] sm:$0xff]  ;;  %v212_v12 = vld [vmem:[%s185_s28 + $0x18] sm:$0xff]  ;;  %v313_v5 = vadd.s32 %v310_v58, %v308_v61 }
  0x1b   : > { %p504_p2 = por %p503_p1, %p502_p0 }
  0x1c   : > { %vm317_vm6 = vcmp.lt.s32.totalorder %v313_v5, 77 }
  0x1d   : > { %p505_p3 = pnand %p504_p2, %p498_p13 }
  0x1e   : > { %218 = vmax.xlane.f32.xlu0 %v217_v7  ;;  %224 = vmax.xlane.f32.xlu1 %v223_v8 }
  0x2f   : > { %268 = vperm.xlu1 %478, %v210_v9  }
  0x33   : > { %271 = vperm.xlu1 %478, %v211_v10  }
  0x34   : > { %265 = vperm.xlu0 %477, %v209_v11  }
  0x37   : > { %274 = vperm.xlu1 %478, %v212_v12  }
  0xa7   : > { %v642_v13 = vpop.xlane.xlu0 %215  ;;  %v644_v14 = vpop.xlane.xlu1 %221 }
  0xa8   : > { %v226_v15 = vsub.f32 %v205_v1, %v642_v13  ;;  %v228_v16 = vsub.f32 %v207_v2, %v644_v14 }
  0xaa   : > { %v230_v17 = vmul.f32 1.442695, %v226_v15  ;;  %v234_v18 = vmul.f32 1.442695, %v228_v16 }
  0xab   : > { %v648_v19 = vpop.xlane.xlu0 %218  ;;  %v650_v20 = vpop.xlane.xlu1 %224 }
  0xac   : > { %479 = vpow2.f32 %v230_v17  ;;  %v227_v21 = vsub.f32 %v629_v3, %v648_v19  ;;  %v229_v22 = vsub.f32 %v633_v6, %v650_v20 }
  0xad   : > { %481 = vpow2.f32 %v234_v18 }
  0xae   : > { %v232_v23 = vmul.f32 1.442695, %v227_v21  ;;  %v236_v24 = vmul.f32 1.442695, %v229_v22 }
  0xaf   : > { %v269_v26 = vpop.permute.xlu1 %268 }
  0xb0   : > { %483 = vpow2.f32 %v232_v23  ;;  %vm277_vm3 = vcmp.eq.s32.totalorder %v263_v27, %v269_v26 }
  0xb1   : > { %485 = vpow2.f32 %v236_v24  ;;  %v281_v44 = vsel %vm277_vm3, 0.9, %v560_v31 }
  0xb2   : > { %v285_v47 = vmul.f32 %v281_v44, %v629_v3 }
  0xb3   : > { %v272_v28 = vpop.permute.xlu1 %271  ;;  %v266_v29 = vpop.permute.xlu0 %265 }
  0xb4   : > { %vm278_vm1 = vcmp.eq.s32.totalorder %v263_v27, %v272_v28  ;;  %vm276_vm2 = vcmp.eq.s32.totalorder %v263_v27, %v266_v29  ;;  %v291_v49 = vsel %vm213_vm0, %v285_v47, 0.0 }
  0xb5   : > { %v282_v32 = vsel %vm278_vm1, 0.9, %v560_v31  ;;  %v280_v38 = vsel %vm276_vm2, 0.9, %v560_v31 }
  0xb6   : > { %v480_v30 = vpop.eup %479  ;;  %v286_v36 = vmul.f32 %v282_v32, %v207_v2  ;;  %v284_v42 = vmul.f32 %v280_v38, %v205_v1  ;;  %v309_v2 = vadd.s32 24, %v306_v56 }
  0xb7   : > { %v482_v33 = vpop.eup %481  ;;  %v238_v34 = vsel %vm213_vm0, %v480_v30, 0.0  ;;  %v275_v45 = vpop.permute.xlu1 %274 }
  0xb8   : > { %239 = vadd.xlane.f32.xlu1 %v238_v34  ;;  %v244_v35 = vsel %vm213_vm0, %v482_v33, 0.0  ;;  %v294_v43 = vsel %vm213_vm0, %v286_v36, 0.0  ;;  %vm279_vm4 = vcmp.eq.s32.totalorder %v263_v27, %v275_v45  ;;  %v288_v46 = vsel %vm213_vm0, %v284_v42, 0.0 }
  0xb9   : > { %v283_v48 = vsel %vm279_vm4, 0.9, %v560_v31  ;;  %v314_v16 = vadd.s32 %v310_v58, %v309_v2 }
  0xba   : > { %v484_v37 = vpop.eup %483  ;;  %v287_v50 = vmul.f32 %v283_v48, %v633_v6  ;;  %v312_v6 = vadd.s32 %v310_v58, %v307_v62 }
  0xbb   : > { %v486_v39 = vpop.eup %485  ;;  %v241_v40 = vsel %vm213_vm0, %v484_v37, 0.0  ;;  %vm318_vm9 = vcmp.lt.s32.totalorder %v314_v16, 77 }
  0xbc   : > { %245 = vadd.xlane.f32.xlu1 %v244_v35  ;;  %242 = vadd.xlane.f32.xlu0 %v241_v40  ;;  %v247_v41 = vsel %vm213_vm0, %v486_v39, 0.0  ;;  %v297_v51 = vsel %vm213_vm0, %v287_v50, 0.0  ;;  %vm316_vm7 = vcmp.lt.s32.totalorder %v312_v6, 77 }
  0xc0   : > { %248 = vadd.xlane.f32.xlu1 %v247_v41  ;;  %295 = vadd.xlane.f32.xlu0 %v294_v43 }
  0xc4   : > { %289 = vadd.xlane.f32.xlu1 %v288_v46 }
  0xc8   : > { %292 = vadd.xlane.f32.xlu1 %v291_v49 }
  0xcc   : > { %298 = vadd.xlane.f32.xlu1 %v297_v51 }
 0x145   : > { %v240_v52 = vpop.xlane.xlu1 %239 }
 0x146   : > { %487 = vlog2.f32 %v240_v52 }
 0x149   : > { %v246_v53 = vpop.xlane.xlu1 %245  ;;  %v243_v54 = vpop.xlane.xlu0 %242 }
 0x14a   : > { %489 = vlog2.f32 %v246_v53 }
 0x14b   : > { %491 = vlog2.f32 %v243_v54 }
 0x14d   : > { %v249_v55 = vpop.xlane.xlu1 %248  ;;  %v296_v12 = vpop.xlane.xlu0 %295 }
 0x14e   : > { %493 = vlog2.f32 %v249_v55 }
 0x150   : > { %v488_v57 = vpop.eup %487 }
 0x151   : > { %v251_v59 = vmul.f32 0.6931472, %v488_v57  ;;  %v290_v60 = vpop.xlane.xlu1 %289 }
 0x153   : > { %v258_v63 = vadd.f32 %v251_v59, %v642_v13 }
 0x154   : > { %v490_v1 = vpop.eup %489 }
 0x155   : > { %v492_v3 = vpop.eup %491  ;;  %v255_v4 = vmul.f32 0.6931472, %v490_v1  ;;  %v300_v8 = vsub.f32 %v258_v63, %v290_v60  ;;  %v293_v9 = vpop.xlane.xlu1 %292 }
 0x156   : > { %v253_v7 = vmul.f32 0.6931472, %v492_v3 }
 0x157   : > { %v260_v10 = vadd.f32 %v255_v4, %v644_v14  ;;  %v319_v18 = vsel %vm315_vm5, %v300_v8, 0.0 }
 0x158   : > { %v494_v11 = vpop.eup %493  ;;  %v259_v15 = vadd.f32 %v253_v7, %v648_v19  ;;  %v324_v26 = vsel %vm323_vm8, %v319_v18, 0.0 }
 0x159   : > { %v257_v17 = vmul.f32 0.6931472, %v494_v11  ;;  %v302_v13 = vsub.f32 %v260_v10, %v296_v12  ;;  %v299_v25 = vpop.xlane.xlu1 %298 }
 0x15a   : > { %v301_v21 = vsub.f32 %v259_v15, %v293_v9 }
 0x15b   : > { %v261_v22 = vadd.f32 %v257_v17, %v650_v20  ;;  %v321_v23 = vsel %vm317_vm6, %v302_v13, 0.0 }
 0x15c   : > { %v320_v24 = vsel %vm316_vm7, %v301_v21, 0.0  ;;  %v327_v19 = vsel %vm323_vm8, %v321_v23, 0.0 }
 0x15d   : > { %v325_v14 = vsel %vm323_vm8, %v320_v24, 0.0  ;;  %v303_v27 = vsub.f32 %v261_v22, %v299_v25 }
 0x15e   : > { %v326_v28 = vadd.f32 %v325_v14, %v324_v26 }
 0x15f   : > { %v322_v29 = vsel %vm318_vm9, %v303_v27, 0.0 }
 0x160   : > { %v328_v30 = vadd.f32 %v327_v19, %v326_v28  ;;  %v329_v31 = vsel %vm323_vm8, %v322_v29, 0.0 }
 0x162   : > { %v330_v32 = vadd.f32 %v329_v31, %v328_v30 }
 0x164   : > { %331 = vadd.xlane.f32.xlu0 %v330_v32 }
 0x1f1   : > { %v332_v33 = vpop.xlane.xlu0 %331 }
 0x1f2   : > { %v333_v34 = vrot.slane %v332_v33, 4 }
 0x1f4   : > { %v334_v35 = vadd.f32 %v333_v34, %v332_v33 }
 0x1f6   : > { %v335_v20 = vrot.slane %v334_v35, 2 }
 0x1f8   : > { %v336_v36 = vadd.f32 %v335_v20, %v334_v35 }
 0x1fa   : > { %v337_v37 = vrot.slane %v336_v36, 1 }
 0x1fc   : > { %v338_v38 = vadd.f32 %v337_v37, %v336_v36 }
 0x1fe   : > { %434 = vpush %v338_v38 }
 0x22f   : > { %s435_s6 = spop %434 }
 0x230   : > { %v340_v39 = vstv %s435_s6 }
 0x231   : > { %341 = vst [vmem:[%s176_s3] sm:$0x1] %v340_v39 }
 0x232   : > { %508 = shalt.err (!%p505_p3)
}
 0x233   : > { %s509_s23 = scalar_lea.hbm %s678_s14, 16  ;;  %s513_s26 = scalar_lea.hbm %s720_s2, 48 }
 0x234   : > { %p510_p4 = scmp.ne.s32.totalorder %s678_s14, %s509_s23  ;;  %p514_p9 = scmp.lt.u32.totalorder %s678_s14, %s720_s2 }
 0x235   : > { %p515_p10 = scmp.lt.u32.totalorder %s513_s26, %s509_s23  ;;  %p517_p12 = scmp.lt.u32.totalorder %s509_s23, %s678_s14 }
 0x236   : > { %p511_p7 = pnand %p510_p4, %p615_p5 }
 0x237   : > { %p516_p11 = por %p515_p10, %p514_p9 }
 0x238   : > { %p512_p8 = pneg %p511_p7 }
 0x239   : > { %p518_p13 = por %p517_p12, %p516_p11 }
 0x23b   : > { %p519_p0 = pnand %p518_p13, %p512_p8 }
 0x23d   : > { %522 = shalt.err (!%p519_p0)
}
 0x23e   : > { %436 = dma.vmem_to_hbm [thread:$0]  (%p615_p5), %s673_s4, 16, %s678_s14, %s343_s16  }
 0x23f PF: > { %p442_p1 = scmp.ge.s32.totalorder %s557_s12, 2  ;;  %s367_s29 = sand.u32 1, %s545_s9  }
 0x240   : > { %s368_s30 = scalar_lea.sflag [#allocation3], %s367_s29 }
 0x241   : > { %p439_p2 = pnand %p442_p1, %p619_p6 }
 0x243   : > { %540 = dma.done.wait (!%p439_p2), %s368_s30, 16  }
 0x244   : > { %542 = vsyncadd (!%p439_p2), %s368_s30, 4294967280  ;;  %p12_p3 = scmp.ge.s32.totalorder %s602_s15, 5   ;;  %s723_s9 = smov %s549_s10 }
 0x245   : > { %s724_s10 = smov %s553_s11  ;;  %s725_s11 = smov %s613_s18 }
 0x246   : > { %s726_s12 = smov %s602_s15  ;;  %14 = sbr.rel (!%p12_p3) target bundleno = 3 (0x3), region = 66 }
 0x24d   :  { %372 = vsyncpa [#allocation3], 1 }
 0x24e   :  { %374 = vsyncpa [#allocation3 + $0x1], 1 }

</bundles_post_ra>
